<compile_context>
chip_gen: v7x
topology: tpu7x:2x2x1
jax: 0.10.0
libtpu: 0.0.40
codegen_flags: <defaults>
</compile_context>

<pallas_src>
import functools

import jax
import jax.numpy as jnp
from jax.experimental import pallas as pl
from jax.experimental.pallas import tpu as pltpu

LN_EPS = 1e-5  # torch.nn.LayerNorm default

_TILE_VMEM_BUDGET = 24 * 1024 * 1024   # bytes of double-buffered tile traffic
_VMEM_LIMIT_BYTES = 48 * 1024 * 1024   # > v5e 16MiB default, < v7x 64MiB physical
_MAX_TILE_ROWS = 1024
_MAX_PACKED_LANES = 512                # packed row width cap (multiple of 128)


def _round_up(x, m):
    return ((x + m - 1) // m) * m


def _sublane_pack(dtype):
    # 8 rows/vreg for 4-byte, 16 for 2-byte, 32 for 1-byte dtypes.
    return 32 // jnp.dtype(dtype).itemsize


def _pick_tile_rows(rows, per_row_bytes, pack, fixed_bytes=0):
    """Largest row-tile that (a) keeps double-buffered VMEM traffic under the
    budget, (b) is a multiple of the sublane pack, (c) leaves >= 2 row blocks
    when the row count allows it (megacore)."""
    budget = max(_TILE_VMEM_BUDGET - fixed_bytes, per_row_bytes * pack)
    t = max(pack, (budget // per_row_bytes) // pack * pack)
    t = min(t, _MAX_TILE_ROWS)
    if rows > pack:
        half = _round_up(-(-rows // 2), pack)          # ceil(rows/2), pack-aligned
        t = min(t, max(half, pack))
    t = min(t, _round_up(rows, pack))
    if t >= rows:
        t = rows   # single block covering everything: block dim == array dim is legal
    return int(t)


def _pick_pack_factor(rows, d):
    """How many logical rows to fold into one lane-dense physical row."""
    if d >= 128 or d <= 0 or (128 % d) != 0:
        return 1
    base = 128 // d
    for m in (4, 2, 1):
        k = base * m
        if k * d <= _MAX_PACKED_LANES and rows % k == 0:
            return k
    return 1


def _segment_matrices(d, k):
    """Reduce (k*d, k) and expand (k, k*d) one-hot segment matrices (f32)."""
    kd = k * d
    seg = jnp.arange(kd, dtype=jnp.int32) // d
    cols = jnp.arange(k, dtype=jnp.int32)
    red = (seg[:, None] == cols[None, :]).astype(jnp.float32)
    exp = (cols[:, None] == seg[None, :]).astype(jnp.float32)
    return red, exp


def _ln_rows_f32(x_f32, gamma_f32, beta_f32):
    """Row-wise LayerNorm (f32 math) over the last dim of a (rows, D) tile."""
    d = x_f32.shape[-1]
    inv_d = 1.0 / float(d)
    s = jnp.sum(x_f32, axis=-1, keepdims=True)
    s2 = jnp.sum(x_f32 * x_f32, axis=-1, keepdims=True)
    mean = s * inv_d
    var = jnp.maximum(s2 * inv_d - mean * mean, 0.0)   # E[x^2] - mean^2, clamped
    inv = jax.lax.rsqrt(var + LN_EPS)
    return (x_f32 - mean) * inv * gamma_f32 + beta_f32


def _layernorm_kernel(x_ref, gamma_ref, beta_ref, o_ref):
    y = _ln_rows_f32(x_ref[...].astype(jnp.float32),
                     gamma_ref[...].astype(jnp.float32),
                     beta_ref[...].astype(jnp.float32))
    o_ref[...] = y.astype(o_ref.dtype)


def _layernorm_packed_kernel(x_ref, gamma_ref, beta_ref, red_ref, exp_ref,
                             o_ref, *, d):
    """k logical rows folded per physical row (lane-dense width k*d).

    Per-segment sums via MXU against the one-hot reduce matrix; broadcast back
    via the expand matrix.  No in-kernel reshapes / relayouts."""
    x = x_f32 = x_ref[...].astype(jnp.float32)          # (T, k*d)
    red = red_ref[...]                                   # (k*d, k)
    exp = exp_ref[...]                                   # (k, k*d)
    inv_d = 1.0 / float(d)
    hp = jax.lax.Precision.HIGHEST
    s = jnp.dot(x_f32, red, preferred_element_type=jnp.float32, precision=hp)
    s2 = jnp.dot(x_f32 * x_f32, red, preferred_element_type=jnp.float32,
                 precision=hp)
    mean = s * inv_d                                     # (T, k)
    var = jnp.maximum(s2 * inv_d - mean * mean, 0.0)
    inv = jax.lax.rsqrt(var + LN_EPS)
    mean_f = jnp.dot(mean, exp, preferred_element_type=jnp.float32, precision=hp)
    inv_f = jnp.dot(inv, exp, preferred_element_type=jnp.float32, precision=hp)
    g = gamma_ref[...].astype(jnp.float32)               # (1, k*d), gamma tiled k x
    b = beta_ref[...].astype(jnp.float32)
    o_ref[...] = ((x - mean_f) * inv_f * g + b).astype(o_ref.dtype)


def _layernorm_matmul_kernel(x_ref, gamma_ref, beta_ref, w_ref, o_ref):
    y = _ln_rows_f32(x_ref[...].astype(jnp.float32),
                     gamma_ref[...].astype(jnp.float32),
                     beta_ref[...].astype(jnp.float32))
    o_ref[...] = jnp.dot(
        y, w_ref[...].astype(jnp.float32),
        preferred_element_type=jnp.float32,
        precision=jax.lax.Precision.HIGHEST,
    ).astype(o_ref.dtype)


def pallas_layernorm(x, gamma, beta):
    """LayerNorm over the last axis of x (any leading shape), native-dtype I/O."""
    orig_shape = x.shape
    d = orig_shape[-1]
    x2 = x.reshape(-1, d)
    rows = x2.shape[0]

    item = jnp.dtype(x.dtype).itemsize
    pack = _sublane_pack(x.dtype)
    gamma_f = gamma.reshape(-1).astype(jnp.float32)
    beta_f = beta.reshape(-1).astype(jnp.float32)

    cost = pl.CostEstimate(
        flops=int(8 * rows * d),
        transcendentals=int(rows),
        bytes_accessed=int(2 * rows * d * item + 2 * d * 4),
    )
    cparams = pltpu.CompilerParams(
        dimension_semantics=("parallel",),
        vmem_limit_bytes=_VMEM_LIMIT_BYTES,
    )

    k = _pick_pack_factor(rows, d)
    if k > 1:
        # Lane-dense packed path: (rows, d) viewed as (rows/k, k*d), contiguous
        # row-major so the reshape is free.
        kd = k * d
        rows_p = rows // k
        xp = x2.reshape(rows_p, kd)
        gamma2 = jnp.tile(gamma_f, (k,)).reshape(1, kd)
        beta2 = jnp.tile(beta_f, (k,)).reshape(1, kd)
        red, exp = _segment_matrices(d, k)

        per_row = 4 * kd * item                 # double-buffered in + out
        fixed = 4 * kd * 4 + 4 * kd * k * 4     # gamma/beta + segment matrices
        tile_rows = _pick_tile_rows(rows_p, per_row, pack, fixed_bytes=fixed)
        grid = pl.cdiv(rows_p, tile_rows)

        out = pl.pallas_call(
            functools.partial(_layernorm_packed_kernel, d=d),
            out_shape=jax.ShapeDtypeStruct((rows_p, kd), x.dtype),
            grid_spec=pltpu.PrefetchScalarGridSpec(
                num_scalar_prefetch=0,
                grid=(grid,),
                in_specs=[
                    pl.BlockSpec((tile_rows, kd), lambda i: (i, 0)),
                    pl.BlockSpec((1, kd), lambda i: (0, 0)),
                    pl.BlockSpec((1, kd), lambda i: (0, 0)),
                    pl.BlockSpec((kd, k), lambda i: (0, 0)),
                    pl.BlockSpec((k, kd), lambda i: (0, 0)),
                ],
                out_specs=pl.BlockSpec((tile_rows, kd), lambda i: (i, 0)),
            ),
            compiler_params=cparams,
            cost_estimate=cost,
        )(xp, gamma2, beta2, red, exp)
        return out.reshape(orig_shape)

    # Fallback: plain row-wise kernel (feature dim kept as-is, masked tail block).
    gamma2 = gamma_f.reshape(1, d)
    beta2 = beta_f.reshape(1, d)
    per_row = 4 * d * item
    fixed = 4 * d * 4
    tile_rows = _pick_tile_rows(rows, per_row, pack, fixed_bytes=fixed)
    grid = pl.cdiv(rows, tile_rows)

    out = pl.pallas_call(
        _layernorm_kernel,
        out_shape=jax.ShapeDtypeStruct((rows, d), x.dtype),
        grid_spec=pltpu.PrefetchScalarGridSpec(
            num_scalar_prefetch=0,
            grid=(grid,),
            in_specs=[
                pl.BlockSpec((tile_rows, d), lambda i: (i, 0)),
                pl.BlockSpec((1, d), lambda i: (0, 0)),
                pl.BlockSpec((1, d), lambda i: (0, 0)),
            ],
            out_specs=pl.BlockSpec((tile_rows, d), lambda i: (i, 0)),
        ),
        compiler_params=cparams,
        cost_estimate=cost,
    )(x2, gamma2, beta2)
    return out.reshape(orig_shape)


def pallas_layernorm_linear(x, gamma, beta, w):
    """Fused LayerNorm(x) @ w: the normalized activation never hits HBM."""
    orig_shape = x.shape
    d = orig_shape[-1]
    dout = w.shape[-1]
    x2 = x.reshape(-1, d)
    rows = x2.shape[0]

    o_dtype = jnp.result_type(x.dtype, w.dtype)
    x_item = jnp.dtype(x.dtype).itemsize
    o_item = jnp.dtype(o_dtype).itemsize
    w_item = jnp.dtype(w.dtype).itemsize
    pack = _sublane_pack(x.dtype)

    per_row = 2 * d * x_item + 2 * dout * o_item
    fixed = 2 * d * dout * w_item + 4 * d * 4      # resident weight + gamma/beta
    tile_rows = _pick_tile_rows(rows, per_row, pack, fixed_bytes=fixed)
    grid = pl.cdiv(rows, tile_rows)

    gamma2 = gamma.reshape(1, d).astype(jnp.float32)
    beta2 = beta.reshape(1, d).astype(jnp.float32)

    cost = pl.CostEstimate(
        flops=int(8 * rows * d + 2 * rows * d * dout),
        transcendentals=int(rows),
        bytes_accessed=int(rows * d * x_item + rows * dout * o_item
                           + d * dout * w_item + 2 * d * 4),
    )

    out = pl.pallas_call(
        _layernorm_matmul_kernel,
        out_shape=jax.ShapeDtypeStruct((rows, dout), o_dtype),
        grid_spec=pltpu.PrefetchScalarGridSpec(
            num_scalar_prefetch=0,
            grid=(grid,),
            in_specs=[
                pl.BlockSpec((tile_rows, d), lambda i: (i, 0)),
                pl.BlockSpec((1, d), lambda i: (0, 0)),
                pl.BlockSpec((1, d), lambda i: (0, 0)),
                pl.BlockSpec((d, dout), lambda i: (0, 0)),
            ],
            out_specs=pl.BlockSpec((tile_rows, dout), lambda i: (i, 0)),
        ),
        compiler_params=pltpu.CompilerParams(
            dimension_semantics=("parallel",),
            vmem_limit_bytes=_VMEM_LIMIT_BYTES,
        ),
        cost_estimate=cost,
    )(x2, gamma2, beta2, w)

    return out.reshape(orig_shape[:-1] + (dout,))


class PreNormPallas:
    """JAX/Pallas port of the PyTorch PreNorm module."""

    def __init__(self, dim, fn, context_dim=None):
        self.fn = fn
        # nn.LayerNorm default init: weight=1, bias=0 (learnable in torch).
        self.gamma = jnp.ones((dim,), jnp.float32)
        self.beta = jnp.zeros((dim,), jnp.float32)
        if context_dim is not None:
            self.ctx_gamma = jnp.ones((context_dim,), jnp.float32)
            self.ctx_beta = jnp.zeros((context_dim,), jnp.float32)
        else:
            self.ctx_gamma = None
            self.ctx_beta = None

    def __call__(self, x, **kwargs):
        if self.ctx_gamma is not None:
            kwargs = dict(kwargs)
            kwargs["context"] = pallas_layernorm(
                kwargs["context"], self.ctx_gamma, self.ctx_beta)
        # If fn can fuse LayerNorm with its own first matmul, let it (avoids an
        # HBM round trip of the normalized activation); otherwise generic path.
        if hasattr(self.fn, "fused_prenorm_call"):
            return self.fn.fused_prenorm_call(x, self.gamma, self.beta, **kwargs)
        return self.fn(pallas_layernorm(x, self.gamma, self.beta), **kwargs)


class MixerFn:
    """Deterministic wrapped fn: fn(x, context) = x @ W1 + mean_ctx @ W2.

    Exposes `fused_prenorm_call` so PreNormPallas fuses LayerNorm(x) with the
    x @ W1 matmul inside one Pallas kernel."""

    def __init__(self, w1, w2):
        self.w1 = w1
        self.w2 = w2

    def _ctx_bias(self, context):
        ctx = jnp.mean(context, axis=1, keepdims=True)          # (B, 1, C)
        return jnp.einsum("bmc,cd->bmd", ctx, self.w2,
                          precision=jax.lax.Precision.HIGHEST)   # (B, 1, Dout)

    def __call__(self, x, context):
        y = jnp.einsum("bnd,de->bne", x, self.w1,
                       precision=jax.lax.Precision.HIGHEST)
        return y + self._ctx_bias(context)

    def fused_prenorm_call(self, x, gamma, beta, context):
        y = pallas_layernorm_linear(x, gamma, beta, self.w1)
        return y + self._ctx_bias(context)


if __name__ == "__main__":
    B, N, D = 2, 16, 32     # x rows=32 -> packed LayerNorm path (lane-dense)
    M, C = 8, 16            # context rows=16 -> packed path (k*C = 256 lanes)
    DOUT = 128              # fused matmul output is lane-dense (128)

    key = jax.random.PRNGKey(0)
    kx, kc, kw1, kw2, kg, kb, kcg, kcb, kxo = jax.random.split(key, 9)
    x = jax.random.normal(kx, (B, N, D), jnp.float32)
    context = jax.random.normal(kc, (B, M, C), jnp.float32)
    W1 = jax.random.normal(kw1, (D, DOUT), jnp.float32) * 0.05
    W2 = jax.random.normal(kw2, (C, DOUT), jnp.float32) * 0.05

    fn = MixerFn(W1, W2)
    prenorm = PreNormPallas(D, fn, context_dim=C)
    # Non-trivial affine params so the gamma/beta path is actually exercised.
    prenorm.gamma = 1.0 + 0.1 * jax.random.normal(kg, (D,), jnp.float32)
    prenorm.beta = 0.1 * jax.random.normal(kb, (D,), jnp.float32)
    prenorm.ctx_gamma = 1.0 + 0.1 * jax.random.normal(kcg, (C,), jnp.float32)
    prenorm.ctx_beta = 0.1 * jax.random.normal(kcb, (C,), jnp.float32)

    out = prenorm(x, context=context)          # fused path + packed context LN
    jax.block_until_ready(out)

    # Pure-JAX reference.
    def ln_ref(v, g, b):
        mu = jnp.mean(v, axis=-1, keepdims=True)
        var = jnp.mean((v - mu) ** 2, axis=-1, keepdims=True)
        return (v - mu) / jnp.sqrt(var + LN_EPS) * g + b

    xr = ln_ref(x, prenorm.gamma, prenorm.beta)
    cr = ln_ref(context, prenorm.ctx_gamma, prenorm.ctx_beta)
    ref = fn(xr, context=cr)
    assert jnp.allclose(out, ref, atol=5e-4, rtol=5e-4), "fused path mismatch"

    # Direct packed-LayerNorm check (k logical rows folded per physical row).
    y_packed = pallas_layernorm(x, prenorm.gamma, prenorm.beta)
    jax.block_until_ready(y_packed)
    assert jnp.allclose(y_packed, xr, atol=1e-4, rtol=1e-4), "packed LN mismatch"

    # Generic (unfused) path with an arbitrary fn, odd row count -> fallback
    # kernel with a masked tail block.
    x_odd = jax.random.normal(kxo, (2, 9, D), jnp.float32)
    gen = PreNormPallas(D, lambda v: v * 2.0)
    out2 = gen(x_odd)
    jax.block_until_ready(out2)
    ref2 = ln_ref(x_odd, gen.gamma, gen.beta) * 2.0
    assert jnp.allclose(out2, ref2, atol=1e-4, rtol=1e-4), "generic path mismatch"

    print("KERNEL_OK")
</pallas_src>

<mosaic_0001>
module attributes {stable_mosaic.version = 11 : i64} {
  func.func @_layernorm_packed_kernel(%arg0: i32, %arg1: memref<1x256xf32, #tpu.memory_space<vmem>>, %arg2: memref<1x256xf32, #tpu.memory_space<vmem>>, %arg3: memref<1x256xf32, #tpu.memory_space<vmem>>, %arg4: memref<256x16xf32, #tpu.memory_space<vmem>>, %arg5: memref<16x256xf32, #tpu.memory_space<vmem>>, %arg6: memref<1x256xf32, #tpu.memory_space<vmem>>) attributes {dimension_semantics = [#tpu.dimension_semantics<parallel>], iteration_bounds = array<i64: 1>, scalar_prefetch = 0 : i64, scratch_operands = 0 : i64, tpu.core_type = #tpu.core_type<tc>, window_params = [{transform_indices = @transform_0, window_bounds = array<i64: 1, 256>}, {pipeline_mode = #tpu.pipeline_mode<synchronous>, transform_indices = @transform_1, window_bounds = array<i64: 1, 256>}, {pipeline_mode = #tpu.pipeline_mode<synchronous>, transform_indices = @transform_2, window_bounds = array<i64: 1, 256>}, {pipeline_mode = #tpu.pipeline_mode<synchronous>, transform_indices = @transform_3, window_bounds = array<i64: 256, 16>}, {pipeline_mode = #tpu.pipeline_mode<synchronous>, transform_indices = @transform_4, window_bounds = array<i64: 16, 256>}, {transform_indices = @transform_5, window_bounds = array<i64: 1, 256>}]} {
    %c0 = arith.constant 0 : index
    %c0_0 = arith.constant 0 : index
    %0 = vector.load %arg1[%c0, %c0_0] : memref<1x256xf32, #tpu.memory_space<vmem>>, vector<1x256xf32>
    %c0_1 = arith.constant 0 : index
    %c0_2 = arith.constant 0 : index
    %1 = vector.load %arg4[%c0_1, %c0_2] : memref<256x16xf32, #tpu.memory_space<vmem>>, vector<256x16xf32>
    %c0_3 = arith.constant 0 : index
    %c0_4 = arith.constant 0 : index
    %2 = vector.load %arg5[%c0_3, %c0_4] : memref<16x256xf32, #tpu.memory_space<vmem>>, vector<16x256xf32>
    %cst = arith.constant dense<0.000000e+00> : vector<1x16xf32>
    %3 = tpu.matmul %0, %1, %cst {dimension_numbers = #tpu.dot_dimension_numbers<[1], [0], [0], [1], [0, 0, 1, 1], [], []>, precision = #tpu.contract_precision<fp32>} : vector<1x256xf32>, vector<256x16xf32>, vector<1x16xf32> -> vector<1x16xf32>
    %4 = arith.mulf %0, %0 : vector<1x256xf32>
    %cst_5 = arith.constant dense<0.000000e+00> : vector<1x16xf32>
    %5 = tpu.matmul %4, %1, %cst_5 {dimension_numbers = #tpu.dot_dimension_numbers<[1], [0], [0], [1], [0, 0, 1, 1], [], []>, precision = #tpu.contract_precision<fp32>} : vector<1x256xf32>, vector<256x16xf32>, vector<1x16xf32> -> vector<1x16xf32>
    %cst_6 = arith.constant 6.250000e-02 : f32
    %6 = vector.broadcast %cst_6 : f32 to vector<1x16xf32>
    %7 = arith.mulf %3, %6 : vector<1x16xf32>
    %cst_7 = arith.constant 6.250000e-02 : f32
    %8 = vector.broadcast %cst_7 : f32 to vector<1x16xf32>
    %9 = arith.mulf %5, %8 : vector<1x16xf32>
    %10 = arith.mulf %7, %7 : vector<1x16xf32>
    %11 = arith.subf %9, %10 : vector<1x16xf32>
    %cst_8 = arith.constant 0.000000e+00 : f32
    %12 = vector.broadcast %cst_8 : f32 to vector<1x16xf32>
    %13 = arith.maximumf %11, %12 : vector<1x16xf32>
    %cst_9 = arith.constant 9.99999974E-6 : f32
    %14 = vector.broadcast %cst_9 : f32 to vector<1x16xf32>
    %15 = arith.addf %13, %14 : vector<1x16xf32>
    %16 = math.rsqrt %15 : vector<1x16xf32>
    %cst_10 = arith.constant dense<0.000000e+00> : vector<1x256xf32>
    %17 = tpu.matmul %7, %2, %cst_10 {dimension_numbers = #tpu.dot_dimension_numbers<[1], [0], [0], [1], [0, 0, 1, 1], [], []>, precision = #tpu.contract_precision<fp32>} : vector<1x16xf32>, vector<16x256xf32>, vector<1x256xf32> -> vector<1x256xf32>
    %cst_11 = arith.constant dense<0.000000e+00> : vector<1x256xf32>
    %18 = tpu.matmul %16, %2, %cst_11 {dimension_numbers = #tpu.dot_dimension_numbers<[1], [0], [0], [1], [0, 0, 1, 1], [], []>, precision = #tpu.contract_precision<fp32>} : vector<1x16xf32>, vector<16x256xf32>, vector<1x256xf32> -> vector<1x256xf32>
    %c0_12 = arith.constant 0 : index
    %c0_13 = arith.constant 0 : index
    %19 = vector.load %arg2[%c0_12, %c0_13] : memref<1x256xf32, #tpu.memory_space<vmem>>, vector<1x256xf32>
    %c0_14 = arith.constant 0 : index
    %c0_15 = arith.constant 0 : index
    %20 = vector.load %arg3[%c0_14, %c0_15] : memref<1x256xf32, #tpu.memory_space<vmem>>, vector<1x256xf32>
    %21 = arith.subf %0, %17 : vector<1x256xf32>
    %22 = arith.mulf %21, %18 : vector<1x256xf32>
    %23 = arith.mulf %22, %19 : vector<1x256xf32>
    %24 = arith.addf %23, %20 : vector<1x256xf32>
    %c0_16 = arith.constant 0 : index
    %c0_17 = arith.constant 0 : index
    %25 = vector.load %arg6[%c0_16, %c0_17] : memref<1x256xf32, #tpu.memory_space<vmem>>, vector<1x256xf32>
    tpu.vector_store %arg6[%c0_16, %c0_17], %24 {strides = array<i32>} : memref<1x256xf32, #tpu.memory_space<vmem>>, vector<1x256xf32>,
    return
  }
  func.func @transform_0(%arg0: i32) -> (i32, i32) {
    %c0_i32 = arith.constant 0 : i32
    %c0_i32_0 = arith.constant 0 : i32
    return %arg0, %c0_i32 : i32, i32
  }
  func.func @transform_1(%arg0: i32) -> (i32, i32) {
    %c0_i32 = arith.constant 0 : i32
    %c0_i32_0 = arith.constant 0 : i32
    %c0_i32_1 = arith.constant 0 : i32
    return %c0_i32, %c0_i32_0 : i32, i32
  }
  func.func @transform_2(%arg0: i32) -> (i32, i32) {
    %c0_i32 = arith.constant 0 : i32
    %c0_i32_0 = arith.constant 0 : i32
    %c0_i32_1 = arith.constant 0 : i32
    return %c0_i32, %c0_i32_0 : i32, i32
  }
  func.func @transform_3(%arg0: i32) -> (i32, i32) {
    %c0_i32 = arith.constant 0 : i32
    %c0_i32_0 = arith.constant 0 : i32
    %c0_i32_1 = arith.constant 0 : i32
    return %c0_i32, %c0_i32_0 : i32, i32
  }
  func.func @transform_4(%arg0: i32) -> (i32, i32) {
    %c0_i32 = arith.constant 0 : i32
    %c0_i32_0 = arith.constant 0 : i32
    %c0_i32_1 = arith.constant 0 : i32
    return %c0_i32, %c0_i32_0 : i32, i32
  }
  func.func @transform_5(%arg0: i32) -> (i32, i32) {
    %c0_i32 = arith.constant 0 : i32
    %c0_i32_0 = arith.constant 0 : i32
    return %arg0, %c0_i32 : i32, i32
  }
}

</mosaic_0001>

<bundles_post_ra>
// kernel: tpu_custom_call.1
= control target key start
LH: loop header
LB: loop body
LE: loop exit
PB: predicated region body
PF: predicated region fallthrough
CT: control target
= control target key end

     0   :  { %s4845_s0 = inlined_call_operand.vmem [shape: f32[1,256], index: 0, kind: input, shape index: {}]   ;;  %s4846_s1 = inlined_call_operand.vmem [shape: f32[1,256], index: 1, kind: input, shape index: {}]   ;;  %s4847_s2 = inlined_call_operand.vmem [shape: f32[1,256], index: 2, kind: input, shape index: {}]   ;;  %s4848_s3 = inlined_call_operand.vmem [shape: f32[256,16], index: 3, kind: input, shape index: {}]   ;;  %s4849_s4 = inlined_call_operand.vmem [shape: f32[16,256], index: 4, kind: input, shape index: {}]   ;;  %s4850_s5 = inlined_call_operand.hbm [shape: f32[1,256], index: 5, kind: output, shape index: {}]  }
   0x1   :  { %v38_v0 = vld [vmem:[%s4848_s3 + $0x80] sm:$0xff]  ;;  %v39_v1 = vld [vmem:[%s4848_s3 + $0x88] sm:$0xff]  ;;  %v40_v7 = vld [vmem:[%s4848_s3 + $0x90] sm:$0xff] }
   0x2   :  { %v22_v2 = vld [vmem:[%s4848_s3] sm:$0xff]  ;;  %v118_v3 = vand.u32 4294901760, %v38_v0  ;;  %v121_v4 = vand.u32 4294901760, %v39_v1  ;;  %v23_v5 = vld [vmem:[%s4848_s3 + $0x8] sm:$0xff]  ;;  %v41_v8 = vld [vmem:[%s4848_s3 + $0x98] sm:$0xff]  ;;  %v124_v10 = vand.u32 4294901760, %v40_v7 }
   0x3   :  { %v70_v6 = vand.u32 4294901760, %v22_v2  ;;  %v73_v9 = vand.u32 4294901760, %v23_v5  ;;  %v127_v11 = vand.u32 4294901760, %v41_v8  ;;  %v24_v12 = vld [vmem:[%s4848_s3 + $0x10] sm:$0xff]  ;;  %v25_v13 = vld [vmem:[%s4848_s3 + $0x18] sm:$0xff]  ;;  %v3823_v14 = vld [vmem:[%s4848_s3 + $0xa0] sm:$0xff] }
   0x4   :  { %v3825_v16 = vpack.c.bf16 %v121_v4, %v118_v3  ;;  %v76_v17 = vand.u32 4294901760, %v24_v12  ;;  %v79_v18 = vand.u32 4294901760, %v25_v13  ;;  %v3830_v19 = vld [vmem:[%s4848_s3 + $0xa8] sm:$0xff]  ;;  %v130_v20 = vand.u32 4294901760, %v3823_v14  ;;  %v3836_v21 = vld [vmem:[%s4848_s3 + $0x20] sm:$0xff]  ;;  %v3853_v27 = vld [vmem:[%s4848_s3 + $0xb0] sm:$0xff] }
   0x5   :  { %v3841_v22 = vld [vmem:[%s4848_s3 + $0x28] sm:$0xff]  ;;  %v3843_v23 = vpack.c.bf16 %v73_v9, %v70_v6  ;;  %v3845_v24 = vpack.c.bf16 %v127_v11, %v124_v10  ;;  %v133_v25 = vand.u32 4294901760, %v3830_v19  ;;  %v3848_v26 = vsub.f32 %v38_v0, %v118_v3  ;;  %v3858_v28 = vld [vmem:[%s4848_s3 + $0xb8] sm:$0xff]  ;;  %v3882_v37 = vld [vmem:[%s4848_s3 + $0x30] sm:$0xff] }
   0x6   :  { %3283 = vmatprep.subr.bf16.mxu0 %v3825_v16  ;;  %v3861_v29 = vpack.c.bf16 %v79_v18, %v76_v17  ;;  %v3863_v30 = vsub.f32 %v39_v1, %v121_v4  ;;  %v82_v31 = vand.u32 4294901760, %v3836_v21  ;;  %v85_v32 = vand.u32 4294901760, %v3841_v22  ;;  %v3904_v46 = vld [vmem:[%s4848_s3 + $0x38] sm:$0xff]  ;;  %v3934_v59 = vld [vmem:[%s4848_s3 + $0xc0] sm:$0xff] }
   0x7   :  { %3285 = vmatpush3.bf16.msra.mxu0 %v3843_v23  ;;  %v3872_v33 = vpack.c.bf16 %v133_v25, %v130_v20  ;;  %v4864_v34 = vand.u32 4294901760, %v3848_v26  ;;  %v3875_v35 = vsub.f32 %v22_v2, %v70_v6  ;;  %v3877_v36 = vsub.f32 %v23_v5, %v73_v9 }
   0x8   :  { %3287 = vmatprep.subr.bf16.mxu0 %v3845_v24  ;;  %v4861_v38 = vand.u32 4294901760, %v3863_v30  ;;  %v3890_v39 = vpack.c.bf16 %v85_v32, %v82_v31  ;;  %v136_v40 = vand.u32 4294901760, %v3853_v27  ;;  %v139_v41 = vand.u32 4294901760, %v3858_v28 }
   0x9   :  { %v297_v42 = vsub.f32 %v3848_v26, %v4864_v34  ;;  %v4860_v43 = vand.u32 4294901760, %v3875_v35  ;;  %v4859_v44 = vand.u32 4294901760, %v3877_v36  ;;  %v3899_v45 = vsub.f32 %v40_v7, %v124_v10 }
   0xa   :  { %v304_v47 = vsub.f32 %v3863_v30, %v4861_v38  ;;  %v3913_v48 = vpack.c.bf16 %v139_v41, %v136_v40  ;;  %v3915_v49 = vsub.f32 %v41_v8, %v127_v11  ;;  %v88_v50 = vand.u32 4294901760, %v3882_v37 }
   0xb   :  { %3289 = vmatpush3.bf16.msra.mxu0 %v3861_v29  ;;  %v298_v51 = vand.u32 4294901760, %v297_v42  ;;  %v185_v52 = vsub.f32 %v3875_v35, %v4860_v43  ;;  %v192_v53 = vsub.f32 %v3877_v36, %v4859_v44  ;;  %v4858_v54 = vand.u32 4294901760, %v3899_v45 }
   0xc   :  { %3291 = vmatprep.subr.bf16.mxu0 %v3872_v33  ;;  %v305_v55 = vand.u32 4294901760, %v304_v47  ;;  %v4855_v56 = vand.u32 4294901760, %v3915_v49  ;;  %v91_v57 = vand.u32 4294901760, %v3904_v46  ;;  %v3929_v58 = vsub.f32 %v24_v12, %v76_v17 }
   0xd   :  { %10 = vsyncpa [#allocation3], 0  ;;  %v186_v60 = vand.u32 4294901760, %v185_v52  ;;  %v193_v61 = vand.u32 4294901760, %v192_v53  ;;  %v311_v62 = vsub.f32 %v3899_v45, %v4858_v54  ;;  %v3939_v63 = vsub.f32 %v25_v13, %v79_v18  ;;  %v3944_v0 = vld [vmem:[%s4848_s3 + $0xc8] sm:$0xff]  ;;  %v3961_v5 = vld [vmem:[%s4848_s3 + $0x40] sm:$0xff] }
   0xe   :  { %v3946_v1 = vpack.c.bf16 %v305_v55, %v298_v51  ;;  %v318_v2 = vsub.f32 %v3915_v49, %v4855_v56  ;;  %v3955_v3 = vpack.c.bf16 %v91_v57, %v88_v50  ;;  %v4854_v4 = vand.u32 4294901760, %v3929_v58  ;;  %v3966_v6 = vld [vmem:[%s4848_s3 + $0x48] sm:$0xff]  ;;  %s3765_s18 = smov [#allocation2]  }
   0xf   :  { %3293 = vmatpush3.bf16.msra.mxu0 %v3890_v39  ;;  %v3969_v7 = vpack.c.bf16 %v193_v61, %v186_v60  ;;  %v312_v8 = vand.u32 4294901760, %v311_v62  ;;  %v4852_v9 = vand.u32 4294901760, %v3939_v63  ;;  %v142_v10 = vand.u32 4294901760, %v3934_v59  ;;  %s2854_s19 = sshll.u32 %s3765_s18, 4  ;;  %s2855_s19 = int_to_ptr.vmem [resolvable:$true] %s2854_s19 }
  0x10   :  { %4921 = vst [vmem:[#allocation5_spill] sm:$0xff] %v3946_v1  ;;  %3315 = vmatprep.subr.bf16.mxu1 %v3946_v1  ;;  %3295 = vmatprep.subr.bf16.mxu0 %v3913_v48  ;;  %v319_v11 = vand.u32 4294901760, %v318_v2  ;;  %v199_v12 = vsub.f32 %v3929_v58, %v4854_v4  ;;  %v145_v13 = vand.u32 4294901760, %v3944_v0  ;;  %v3982_v17 = vsub.f32 %v3823_v14, %v130_v20  ;;  %v3998_v14 = vld [vmem:[%s4848_s3 + $0xd0] sm:$0xff]  ;;  %v4003_v20 = vld [vmem:[%s4848_s3 + $0xd8] sm:$0xff]  ;;  %s3739_s20 = scalar_lea.vmem %s2855_s19, 32  ;;  %p3744_p1 = scmp.lt.s32.totalorder %s2855_s19, %s2855_s19 }
  0x11   :  { %4922 = vst [vmem:[#allocation6_spill] sm:$0xff] %v3969_v7  ;;  %3317 = vmatpush3.bf16.msra.mxu1 %v3969_v7  ;;  %v206_v18 = vsub.f32 %v3939_v63, %v4852_v9  ;;  %v3991_v42 = vsub.f32 %v3830_v19, %v133_v25  ;;  %v94_v47 = vand.u32 4294901760, %v3961_v5  ;;  %v97_v51 = vand.u32 4294901760, %v3966_v6  ;;  %p3740_p0 = scmp.ne.s32.totalorder %s2855_s19, %s3739_s20  ;;  %p3745_p2 = scmp.lt.s32.totalorder %s3739_s20, %s3739_s20 }
  0x12   :  { %v4005_v52 = vpack.c.bf16 %v319_v11, %v312_v8  ;;  %v200_v53 = vand.u32 4294901760, %v199_v12  ;;  %v4011_v19 = vpack.c.bf16 %v145_v13, %v142_v10  ;;  %v4851_v25 = vand.u32 4294901760, %v3982_v17 }
  0x13   :  { %3297 = vmatpush3.bf16.msra.mxu0 %v3955_v3  ;;  %v207_v55 = vand.u32 4294901760, %v206_v18  ;;  %v4853_v60 = vand.u32 4294901760, %v3991_v42  ;;  %v4020_v61 = vpack.c.bf16 %v97_v51, %v94_v47  ;;  %v4025_v62 = vsub.f32 %v3836_v21, %v82_v31  ;;  %v4042_v21 = vld [vmem:[%s4848_s3 + $0x50] sm:$0xff]  ;;  %p3746_p3 = por %p3745_p2, %p3744_p1 }
  0x14   :  { %4923 = vst [vmem:[#allocation7_spill] sm:$0xff] %v4005_v52  ;;  %3319 = vmatprep.subr.bf16.mxu1 %v4005_v52  ;;  %3299 = vmatprep.subr.bf16.mxu0 %v4011_v19  ;;  %v325_v2 = vsub.f32 %v3982_v17, %v4851_v25  ;;  %v4035_v8 = vsub.f32 %v3841_v22, %v85_v32  ;;  %v4872_v11 = vand.u32 4294901760, %v3998_v14  ;;  %v4871_v12 = vand.u32 4294901760, %v4003_v20  ;;  %v4058_v32 = vld [vmem:[%s4848_s3 + $0x58] sm:$0xff] }
  0x15   :  { %v4044_v31 = vpack.c.bf16 %v207_v55, %v200_v53  ;;  %v332_v18 = vsub.f32 %v3991_v42, %v4853_v60  ;;  %v4856_v25 = vand.u32 4294901760, %v4025_v62  ;;  %v4053_v22 = vsub.f32 %v3853_v27, %v136_v40  ;;  %p3747_p4 = pnand %p3746_p3, %p3740_p0 }
  0x16   :  { %v326_v9 = vand.u32 4294901760, %v325_v2  ;;  %v4857_v53 = vand.u32 4294901760, %v4035_v8  ;;  %v4065_v55 = vpack.c.bf16 %v4871_v12, %v4872_v11  ;;  %v4070_v60 = vsub.f32 %v3858_v28, %v139_v41 }
  0x17   :  { %4924 = vst [vmem:[#allocation8_spill] sm:$0xff] %v4044_v31  ;;  %3321 = vmatpush3.bf16.msra.mxu1 %v4044_v31  ;;  %v333_v27 = vand.u32 4294901760, %v332_v18  ;;  %3301 = vmatpush3.bf16.msra.mxu0 %v4020_v61  ;;  %v213_v40 = vsub.f32 %v4025_v62, %v4856_v25  ;;  %v4863_v2 = vand.u32 4294901760, %v4053_v22  ;;  %v4867_v4 = vand.u32 4294901760, %v4042_v21  ;;  %v4093_v25 = vld [vmem:[%s4848_s3 + $0xe0] sm:$0xff] }
  0x18   :  { %v220_v56 = vsub.f32 %v4035_v8, %v4857_v53  ;;  %3303 = vmatprep.subr.bf16.mxu0 %v4065_v55  ;;  %v4862_v28 = vand.u32 4294901760, %v4070_v60  ;;  %v4866_v41 = vand.u32 4294901760, %v4058_v32  ;;  %v4088_v18 = vsub.f32 %v3882_v37, %v88_v50  ;;  %v4098_v53 = vld [vmem:[%s4848_s3 + $0xe8] sm:$0xff] }
  0x19   :  { %v4100_v54 = vpack.c.bf16 %v333_v27, %v326_v9  ;;  %v214_v44 = vand.u32 4294901760, %v213_v40  ;;  %v339_v43 = vsub.f32 %v4053_v22, %v4863_v2  ;;  %v4108_v37 = vsub.f32 %v3904_v46, %v91_v57  ;;  %v4123_v40 = vld [vmem:[%s4848_s3 + $0x60] sm:$0xff]  ;;  %v4132_v2 = vld [vmem:[%s4848_s3 + $0x68] sm:$0xff] }
  0x1a   :  { %v221_v50 = vand.u32 4294901760, %v220_v56  ;;  %v346_v38 = vsub.f32 %v4070_v60, %v4862_v28  ;;  %v4117_v9 = vpack.c.bf16 %v4866_v41, %v4867_v4  ;;  %v4869_v27 = vand.u32 4294901760, %v4088_v18 }
  0x1b   :  { %4925 = vst [vmem:[#allocation9_spill] sm:$0xff] %v4100_v54  ;;  %3323 = vmatprep.subr.bf16.mxu1 %v4100_v54  ;;  %v340_v46 = vand.u32 4294901760, %v339_v43  ;;  %v4868_v56 = vand.u32 4294901760, %v4108_v37  ;;  %v154_v57 = vand.u32 4294901760, %v4093_v25  ;;  %v4870_v28 = vand.u32 4294901760, %v4098_v53 }
  0x1c   :  { %v4134_v34 = vpack.c.bf16 %v221_v50, %v214_v44  ;;  %v347_v15 = vand.u32 4294901760, %v346_v38  ;;  %3305 = vmatpush3.bf16.msra.mxu0 %v4117_v9  ;;  %v227_v43 = vsub.f32 %v4088_v18, %v4869_v27  ;;  %v4143_v41 = vsub.f32 %v3934_v59, %v142_v10  ;;  %v4161_v59 = vld [vmem:[%s4848_s3 + $0xf0] sm:$0xff]  ;;  %v4166_v10 = vld [vmem:[%s4848_s3 + $0xf8] sm:$0xff] }
  0x1d   :  { %v234_v4 = vsub.f32 %v4108_v37, %v4868_v56  ;;  %v4150_v44 = vpack.c.bf16 %v4870_v28, %v154_v57  ;;  %v4155_v38 = vsub.f32 %v3944_v0, %v145_v13  ;;  %v4875_v50 = vand.u32 4294901760, %v4123_v40 }
  0x1e   :  { %4926 = vst [vmem:[#allocation10_spill] sm:$0xff] %v4134_v34  ;;  %3325 = vmatpush3.bf16.msra.mxu1 %v4134_v34  ;;  %v4169_v56 = vpack.c.bf16 %v347_v15, %v340_v46  ;;  %v228_v27 = vand.u32 4294901760, %v227_v43  ;;  %v4873_v0 = vand.u32 4294901760, %v4143_v41  ;;  %v4874_v13 = vand.u32 4294901760, %v4132_v2 }
  0x1f   :  { %4927 = vst [vmem:[#allocation11_spill] sm:$0xff] %v4150_v44  ;;  %v235_v28 = vand.u32 4294901760, %v234_v4  ;;  %3307 = vmatprep.subr.bf16.mxu0 %v4150_v44  ;;  %v4876_v12 = vand.u32 4294901760, %v4155_v38  ;;  %v4178_v11 = vsub.f32 %v3961_v5, %v94_v47  ;;  %v4183_v15 = vsub.f32 %v3966_v6, %v97_v51  ;;  %v4200_v6 = vld [vmem:[%s4848_s3 + $0x70] sm:$0xff] }
  0x20   :  { %4928 = vst [vmem:[#allocation12_spill] sm:$0xff] %v4169_v56  ;;  %3327 = vmatprep.subr.bf16.mxu1 %v4169_v56  ;;  %v353_v4 = vsub.f32 %v4143_v41, %v4873_v0  ;;  %v4193_v46 = vpack.c.bf16 %v4874_v13, %v4875_v50  ;;  %v4880_v5 = vand.u32 4294901760, %v4161_v59  ;;  %v4212_v50 = vld [vmem:[%s4848_s3 + $0x78] sm:$0xff]  ;;  %v4934_v13 = vand.u32 4294901760, %v4003_v20 }
  0x21   :  { %v4202_v51 = vpack.c.bf16 %v235_v28, %v228_v27  ;;  %v360_v43 = vsub.f32 %v4155_v38, %v4876_v12  ;;  %v4931_v28 = vand.u32 4294901760, %v4166_v10  ;;  %v4933_v12 = vand.u32 4294901760, %v3998_v14 }
  0x22   :  { %4929 = vst [vmem:[#allocation13_spill] sm:$0xff] %v4193_v46  ;;  %v354_v47 = vand.u32 4294901760, %v353_v4  ;;  %3309 = vmatpush3.bf16.msra.mxu0 %v4193_v46  ;;  %v4229_v56 = vsub.f32 %v4003_v20, %v4934_v13  ;;  %v4935_v34 = vand.u32 4294901760, %v4178_v11  ;;  %v4937_v13 = vand.u32 4294901760, %v4042_v21 }
  0x23   :  { %4930 = vst [vmem:[#allocation14_spill] sm:$0xff] %v4202_v51  ;;  %v4219_v27 = vpack.c.bf16 %v4931_v28, %v4880_v5  ;;  %v4224_v0 = vsub.f32 %v3998_v14, %v4933_v12  ;;  %3329 = vmatpush3.bf16.msra.mxu1 %v4202_v51  ;;  %v361_v4 = vand.u32 4294901760, %v360_v43  ;;  %v4936_v28 = vand.u32 4294901760, %v4183_v15 }
  0x24   :  { %v241_v54 = vsub.f32 %v4178_v11, %v4935_v34  ;;  %v4246_v43 = vsub.f32 %v4042_v21, %v4937_v13  ;;  %v4940_v12 = vand.u32 4294901760, %v4229_v56  ;;  %v4941_v21 = vand.u32 4294901760, %v4200_v6 }
  0x25   :  { %4932 = vst [vmem:[#allocation15_spill] sm:$0xff] %v4219_v27  ;;  %v248_v5 = vsub.f32 %v4183_v15, %v4936_v28  ;;  %3311 = vmatprep.subr.bf16.mxu0 %v4219_v27  ;;  %v4885_v14 = vand.u32 4294901760, %v4224_v0  ;;  %v4248_v34 = vpack.c.bf16 %v361_v4, %v354_v47  ;;  %v4939_v28 = vand.u32 4294901760, %v4058_v32 }
  0x26   :  { %v242_v51 = vand.u32 4294901760, %v241_v54  ;;  %v374_v7 = vsub.f32 %v4229_v56, %v4940_v12  ;;  %v4942_v47 = vand.u32 4294901760, %v4212_v50  ;;  %v4887_v54 = vand.u32 4294901760, %v4246_v43 }
  0x27   :  { %4938 = vst [vmem:[#allocation16_spill] sm:$0xff] %v4248_v34  ;;  %v249_v52 = vand.u32 4294901760, %v248_v5  ;;  %v4253_v31 = vsub.f32 %v4058_v32, %v4939_v28  ;;  %v367_v20 = vsub.f32 %v4224_v0, %v4885_v14  ;;  %3331 = vmatprep.subr.bf16.mxu1 %v4248_v34  ;;  %v4945_v13 = vlaneseq }
  0x28   :  { %v4265_v4 = vpack.c.bf16 %v4942_v47, %v4941_v21  ;;  %v4276_v14 = vsub.f32 %v4093_v25, %v154_v57  ;;  %v375_v1 = vand.u32 4294901760, %v374_v7  ;;  %v255_v21 = vsub.f32 %v4246_v43, %v4887_v54 }
  0x29   :  { %v4269_v32 = vpack.c.bf16 %v249_v52, %v242_v51  ;;  %v4889_v5 = vand.u32 4294901760, %v4253_v31  ;;  %v4273_v28 = vshrl.u32 %v4945_v13, 7  ;;  %v368_v12 = vand.u32 4294901760, %v367_v20  ;;  %v4285_v52 = vld [vmem:[%s4845_s0] sm:$0x3] }
  0x2a   :  { %4943 = vst [vmem:[#allocation17_spill] sm:$0xff] %v4265_v4  ;;  %3313 = vmatpush3.bf16.msra.mxu0 %v4265_v4  ;;  %4947 = vst [vmem:[#allocation20_spill] sm:$0xff] %v4285_v52  ;;  %v4948_v51 = vand.u32 4294901760, %v4098_v53  ;;  %v4894_v57 = vand.u32 4294901760, %v4276_v14  ;;  %v4300_v20 = vpack.c.bf16 %v3863_v30, %v3848_v26  ;;  %v256_v13 = vand.u32 4294901760, %v255_v21 }
  0x2b   :  { %4944 = vst [vmem:[#allocation18_spill] sm:$0xff] %v4269_v32  ;;  %4946 = vst [vmem:[#allocation19_spill] sm:$0xff] %v4273_v28  ;;  %3333 = vmatpush3.bf16.msra.mxu1 %v4269_v32  ;;  %v262_v7 = vsub.f32 %v4253_v31, %v4889_v5  ;;  %v4893_v25 = vsub.s32 1, %v4273_v28  ;;  %v4302_v54 = vpack.c.bf16 %v375_v1, %v368_v12  ;;  %v4951_v4 = vand.u32 4294901760, %v4123_v40 }
  0x2c   :  { %v4290_v47 = vsub.f32 %v4098_v53, %v4948_v51  ;;  %4949 = vst [vmem:[#allocation21_spill] sm:$0xff] %v4300_v20  ;;  %v4902_v51 = vsub.s32 0, %v4273_v28  ;;  %v381_v34 = vsub.f32 %v4276_v14, %v4894_v57  ;;  %3347 = vmatprep.subr.bf16.mxu0 %v4300_v20  ;;  %v4955_v28 = vand.u32 4294901760, %v4161_v59 }
  0x2d   :  { %4950 = vst [vmem:[#allocation22_spill] sm:$0xff] %v4302_v54  ;;  %v263_v32 = vand.u32 4294901760, %v262_v7  ;;  %v66_v5 = vrot.slane %v4285_v52, %v4893_v25  ;;  %v4316_v1 = vsub.f32 %v4123_v40, %v4951_v4  ;;  %3335 = vmatprep.subr.bf16.mxu1 %v4302_v54  ;;  %v4952_v7 = vand.u32 4294901760, %v4132_v2 }
  0x2e   :  { %v4899_v53 = vand.u32 4294901760, %v4290_v47  ;;  %v62_v21 = vrot.slane %v4285_v52, %v4902_v51  ;;  %v382_v40 = vand.u32 4294901760, %v381_v34  ;;  %v4341_v51 = vsub.f32 %v4161_v59, %v4955_v28 }
  0x2f   :  { %v4328_v25 = vsub.f32 %v4132_v2, %v4952_v7  ;;  %v4330_v57 = vpack.c.bf16 %v263_v32, %v256_v13  ;;  %v4332_v20 = vand.u32 4294901760, %v66_v5  ;;  %v4903_v4 = vand.u32 4294901760, %v4316_v1 }
  0x30   :  { %v388_v12 = vsub.f32 %v4290_v47, %v4899_v53  ;;  %v4335_v27 = vand.u32 4294901760, %v62_v21  ;;  %v4956_v32 = vand.u32 4294901760, %v4166_v10  ;;  %vm1812_vm0 = vcmask 130048  }
  0x31   :  { %4953 = vst [vmem:[#allocation23_spill] sm:$0xff] %v4330_v57  ;;  %4954 = vst [vmem:[#allocation24_spill] sm:$0xff] %v4332_v20  ;;  %v4905_v53 = vand.u32 4294901760, %v4328_v25  ;;  %3337 = vmatpush3.bf16.msra.mxu1 %v4330_v57  ;;  %v4345_v2 = vsub.f32 %v66_v5, %v4332_v20  ;;  %v269_v34 = vsub.f32 %v4316_v1, %v4903_v4  ;;  %v4909_v5 = vand.u32 4294901760, %v4341_v51 }
  0x32   :  { %v389_v54 = vand.u32 4294901760, %v388_v12  ;;  %v4353_v13 = vsub.f32 %v4166_v10, %v4956_v32  ;;  %v4358_v7 = vsub.f32 %v62_v21, %v4335_v27  ;;  %406 = vmatprep.mubr.f32.mxu1 %v4332_v20  ;;  %v4958_v10 = vand.u32 4294901760, %v4200_v6 }
  0x33   :  { %v276_v59 = vsub.f32 %v4328_v25, %v4905_v53  ;;  %v167_v28 = vand.u32 4294901760, %v4345_v2  ;;  %v270_v4 = vand.u32 4294901760, %v269_v34  ;;  %v395_v32 = vsub.f32 %v4341_v51, %v4909_v5 }
  0x34   :  { %v4355_v12 = vpack.c.bf16 %v389_v54, %v382_v40  ;;  %v4370_v54 = vsub.f32 %v4200_v6, %v4958_v10  ;;  %v4918_v21 = vand.u32 4294901760, %v4358_v7  ;;  %v4959_v53 = vand.u32 4294901760, %v4212_v50 }
  0x35   :  { %v277_v40 = vand.u32 4294901760, %v276_v59  ;;  %v168_v57 = vsub.f32 %v4345_v2, %v167_v28  ;;  %v4960_v52 = vand.u32 4294901760, %v4353_v13  ;;  %v396_v5 = vand.u32 4294901760, %v395_v32 }
  0x36   :  { %4957 = vst [vmem:[#allocation25_spill] sm:$0xff] %v4355_v12  ;;  %3339 = vmatprep.subr.bf16.mxu1 %v4355_v12  ;;  %v4380_v34 = vsub.f32 %v4212_v50, %v4959_v53  ;;  %v4916_v10 = vand.u32 4294901760, %v4370_v54  ;;  %v174_v59 = vsub.f32 %v4358_v7, %v4918_v21  ;;  %v4395_v50 = vpack.c.bf16 %v3877_v36, %v3875_v35 }
  0x37   :  { %v402_v6 = vsub.f32 %v4353_v13, %v4960_v52  ;;  %v4390_v12 = vpack.c.bf16 %v277_v40, %v270_v4  ;;  %v169_v46 = vand.u32 4294901760, %v168_v57  ;;  %v4403_v4 = vpack.c.bf16 %v3915_v49, %v3899_v45 }
  0x38   :  { %v4917_v20 = vand.u32 4294901760, %v4380_v34  ;;  %v283_v52 = vsub.f32 %v4370_v54, %v4916_v10  ;;  %v175_v44 = vand.u32 4294901760, %v174_v59  ;;  %v4414_v59 = vpack.c.bf16 %v3939_v63, %v3929_v58 }
  0x39   :  { %v403_v53 = vand.u32 4294901760, %v402_v6  ;;  %3341 = vmatpush3.bf16.msra.mxu1 %v4390_v12  ;;  %4961 = vst [vmem:[#allocation26_spill] sm:$0xff] %v4403_v4  ;;  %170 = vmatprep.mubr.f32.mxu0 %v169_v46  ;;  %v4418_v10 = vpack.c.bf16 %v3991_v42, %v3982_v17 }
  0x3a   :  { %v290_v57 = vsub.f32 %v4380_v34, %v4917_v20  ;;  %v284_v32 = vand.u32 4294901760, %v283_v52  ;;  %176 = vmatmul.mubr.f32.vlgmr.msra.gmra.mrb[0].mxu0 %v175_v44  ;;  %v4425_v44 = vpack.c.bf16 %v4035_v8, %v4025_v62  ;;  %v4966_v20 = vand.u32 4294901760, %v3877_v36 }
  0x3b   :  { %v4408_v40 = vpack.c.bf16 %v403_v53, %v396_v5  ;;  %3349 = vmatpush3.bf16.msra.mxu0 %v4395_v50  ;;  %543 = vmatprep.mubr.f32.mxu0 %v4345_v2  ;;  %v4963_v5 = vand.u32 4294901760, %v3848_v26  ;;  %v4964_v53 = vand.u32 4294901760, %v3863_v30  ;;  %v4969_v2 = vand.u32 4294901760, %v3929_v58 }
  0x3c   :  { %v291_v6 = vand.u32 4294901760, %v290_v57  ;;  %3351 = vmatprep.subr.bf16.mxu0 %v4403_v4  ;;  %v4965_v57 = vand.u32 4294901760, %v3875_v35  ;;  %v4970_v26 = vand.u32 4294901760, %v3939_v63  ;;  %v4971_v30 = vand.u32 4294901760, %v3982_v17 }
  0x3d   :  { %4962 = vst [vmem:[#allocation27_spill] sm:$0xff] %v4408_v40  ;;  %3343 = vmatprep.subr.bf16.mxu1 %v4408_v40  ;;  %v4432_v52 = vpack.c.bf16 %v4964_v53, %v4963_v5  ;;  %v4972_v35 = vand.u32 4294901760, %v3991_v42  ;;  %v4973_v36 = vand.u32 4294901760, %v4025_v62  ;;  %v4975_v58 = vand.u32 4294901760, %v4053_v22 }
  0x3e   :  { %v4421_v46 = vpack.c.bf16 %v291_v6, %v284_v32  ;;  %v4438_v21 = vpack.c.bf16 %v4966_v20, %v4965_v57  ;;  %v4967_v32 = vand.u32 4294901760, %v3899_v45  ;;  %v4968_v6 = vand.u32 4294901760, %v3915_v49 }
  0x3f   :  { %v4450_v40 = vpack.c.bf16 %v4970_v26, %v4969_v2  ;;  %v4456_v5 = vpack.c.bf16 %v4972_v35, %v4971_v30  ;;  %v4974_v45 = vand.u32 4294901760, %v4035_v8  ;;  %v4976_v63 = vand.u32 4294901760, %v4070_v60  ;;  %3353 = vmatpush3.bf16.msra.mxu0 %v4414_v59 }
  0x40   :  { %v4444_v4 = vpack.c.bf16 %v4968_v6, %v4967_v32  ;;  %3345 = vmatpush3.bf16.msra.mxu1 %v4421_v46  ;;  %v4977_v17 = vand.u32 4294901760, %v4088_v18  ;;  %v4978_v42 = vand.u32 4294901760, %v4108_v37  ;;  %v4979_v57 = vand.u32 4294901760, %v4143_v41  ;;  %3355 = vmatprep.subr.bf16.mxu0 %v4418_v10 }
  0x41   :  { %v4463_v49 = vpack.c.bf16 %v4974_v45, %v4973_v36  ;;  %v4469_v20 = vpack.c.bf16 %v4976_v63, %v4975_v58  ;;  %v4980_v62 = vand.u32 4294901760, %v4155_v38  ;;  %3379 = vmatprep.subr.bf16.mxu1 %v3825_v16  ;;  %v4981_v8 = vand.u32 4294901760, %v4178_v11 }
  0x42   :  { %v4475_v53 = vpack.c.bf16 %v4978_v42, %v4977_v17  ;;  %v4982_v6 = vand.u32 4294901760, %v4183_v15  ;;  %v4983_v26 = vand.u32 4294901760, %v4224_v0  ;;  %v4984_v30 = vand.u32 4294901760, %v4229_v56 }
  0x43   :  { %v4481_v32 = vpack.c.bf16 %v4980_v62, %v4979_v57  ;;  %v4985_v36 = vand.u32 4294901760, %v4246_v43  ;;  %v4986_v45 = vand.u32 4294901760, %v4253_v31  ;;  %v4506_v63 = vpack.c.bf16 %v4070_v60, %v4053_v22  ;;  %408 = vmatmul.mubr.f32.vlgmr.msra.gmra.mrb[0].mxu1 %v4335_v27  ;;  %3357 = vmatpush3.bf16.msra.mxu0 %v4425_v44 }
  0x44   :  { %v4489_v2 = vpack.c.bf16 %v4982_v6, %v4981_v8  ;;  %v4495_v35 = vpack.c.bf16 %v4984_v30, %v4983_v26  ;;  %v4987_v17 = vand.u32 4294901760, %v4276_v14  ;;  %v4988_v42 = vand.u32 4294901760, %v4290_v47  ;;  %3381 = vmatpush3.bf16.msra.mxu1 %v3843_v23  ;;  %650 = vmatprep.mubr.f32.mxu1 %v167_v28  ;;  %v4998_v26 = vld [vmem:[#allocation19_spill] sm:$0xff] }
  0x45   :  { %v4501_v58 = vpack.c.bf16 %v4986_v45, %v4985_v36  ;;  %v4989_v62 = vand.u32 4294901760, %v4316_v1  ;;  %v4990_v8 = vand.u32 4294901760, %v4328_v25  ;;  %3383 = vmatprep.subr.bf16.mxu1 %v3845_v24  ;;  %v4526_v60 = vpack.c.bf16 %v4108_v37, %v4088_v18  ;;  %3359 = vmatprep.subr.bf16.mxu0 %v4506_v63 }
  0x46   :  { %v4512_v57 = vpack.c.bf16 %v4988_v42, %v4987_v17  ;;  %v4531_v22 = vpack.c.bf16 %v4155_v38, %v4143_v41  ;;  %v4538_v28 = vpack.c.bf16 %v4183_v15, %v4178_v11  ;;  %v4543_v18 = vpack.c.bf16 %v4229_v56, %v4224_v0  ;;  %v4991_v38 = vld [vmem:[#allocation11_spill] sm:$0xff]  ;;  %v4992_v0 = vld [vmem:[#allocation13_spill] sm:$0xff] }
  0x47   :  { %v4518_v6 = vpack.c.bf16 %v4990_v8, %v4989_v62  ;;  %3361 = vmatpush3.bf16.msra.mxu0 %v4526_v60  ;;  %v4550_v41 = vpack.c.bf16 %v4253_v31, %v4246_v43  ;;  %v4555_v11 = vpack.c.bf16 %v4290_v47, %v4276_v14  ;;  %v4562_v37 = vpack.c.bf16 %v4328_v25, %v4316_v1  ;;  %v4993_v15 = vld [vmem:[#allocation15_spill] sm:$0xff]  ;;  %v4994_v14 = vld [vmem:[#allocation24_spill] sm:$0xff]  ;;  %v4995_v43 = vld [vmem:[#allocation17_spill] sm:$0xff] }
  0x48   :  { %3385 = vmatpush3.bf16.msra.mxu1 %v3861_v29  ;;  %3363 = vmatprep.subr.bf16.mxu0 %v4531_v22  ;;  %v4567_v31 = vpack.c.bf16 %v4353_v13, %v4341_v51  ;;  %v4574_v56 = vpack.c.bf16 %v4380_v34, %v4370_v54  ;;  %v4996_v47 = vld [vmem:[#allocation20_spill] sm:$0xff]  ;;  %v4997_v1 = vand.u32 4294901760, %v4358_v7  ;;  %v4999_v30 = vsub.s32 1, %v4998_v26 }
  0x49   :  { %3387 = vmatprep.subr.bf16.mxu1 %v3872_v33  ;;  %v931_v25 = vmul.f32 %v4996_v47, %v4996_v47  ;;  %v5000_v17 = vand.u32 4294901760, %v4341_v51  ;;  %v5001_v42 = vand.u32 4294901760, %v4353_v13 }
  0x4b   :  { %3365 = vmatpush3.bf16.msra.mxu0 %v4538_v28  ;;  %v940_v36 = vrot.slane %v931_v25, %v4999_v30  ;;  %v4623_v62 = vpack.c.bf16 %v5001_v42, %v5000_v17  ;;  %v5007_v42 = vld [vmem:[#allocation7_spill] sm:$0xff] }
  0x4c   :  { %3389 = vmatpush3.bf16.msra.mxu1 %v3890_v39  ;;  %3367 = vmatprep.subr.bf16.mxu0 %v4543_v18 }
  0x4d   :  { %3391 = vmatprep.subr.bf16.mxu1 %v3913_v48 }
  0x4f   :  { %3369 = vmatpush3.bf16.msra.mxu0 %v4550_v41 }
  0x50   :  { %3393 = vmatpush3.bf16.msra.mxu1 %v3955_v3  ;;  %3371 = vmatprep.subr.bf16.mxu0 %v4555_v11 }
  0x51   :  { %3395 = vmatprep.subr.bf16.mxu1 %v4011_v19 }
  0x53   :  { %3373 = vmatpush3.bf16.msra.mxu0 %v4562_v37 }
  0x54   :  { %3397 = vmatpush3.bf16.msra.mxu1 %v4020_v61  ;;  %3375 = vmatprep.subr.bf16.mxu0 %v4567_v31 }
  0x55   :  { %3399 = vmatprep.subr.bf16.mxu1 %v4065_v55 }
  0x57   :  { %3377 = vmatpush3.bf16.msra.mxu0 %v4574_v56 }
  0x58   :  { %3401 = vmatpush3.bf16.msra.mxu1 %v4117_v9  ;;  %3411 = vmatprep.subr.bf16.mxu0 %v4432_v52 }
  0x59   :  { %3403 = vmatprep.subr.bf16.mxu1 %v4991_v38 }
  0x5a   :  { %546 = vmatmul.mubr.f32.vlgmr.msra.gmra.mrb[2].mxu0 %v4358_v7  ;;  %v4606_v7 = vand.u32 4294901760, %v940_v36 }
  0x5b   :  { %3413 = vmatpush3.bf16.msra.mxu0 %v4438_v21  ;;  %820 = vmatprep.mubr.f32.mxu0 %v4994_v14 }
  0x5c   :  { %3405 = vmatpush3.bf16.msra.mxu1 %v4992_v0  ;;  %3415 = vmatprep.subr.bf16.mxu0 %v4444_v4  ;;  %v4613_v45 = vsub.f32 %v940_v36, %v4606_v7  ;;  %v5006_v36 = vsub.s32 0, %v4998_v26 }
  0x5d   :  { %3407 = vmatprep.subr.bf16.mxu1 %v4993_v15 }
  0x5e   :  { %v1041_v8 = vand.u32 4294901760, %v4613_v45  ;;  %v936_v17 = vrot.slane %v931_v25, %v5006_v36  ;;  %v5013_v36 = vld [vmem:[#allocation16_spill] sm:$0xff] }
  0x5f   :  { %3417 = vmatpush3.bf16.msra.mxu0 %v4450_v40 }
  0x60   :  { %3409 = vmatpush3.bf16.msra.mxu1 %v4995_v43  ;;  %3419 = vmatprep.subr.bf16.mxu0 %v4456_v5  ;;  %v1042_v51 = vsub.f32 %v4613_v45, %v1041_v8 }
  0x61   :  { %3443 = vmatprep.subr.bf16.mxu1 %v3825_v16 }
  0x62   :  { %v1043_v13 = vand.u32 4294901760, %v1042_v51  ;;  %v5010_v51 = vld [vmem:[#allocation10_spill] sm:$0xff] }
  0x63   :  { %654 = vmatmul.mubr.f32.vlgmr.msra.gmra.mrb[2].mxu1 %v4997_v1  ;;  %3421 = vmatpush3.bf16.msra.mxu0 %v4463_v49  ;;  %v5003_v1 = vand.u32 4294901760, %v4380_v34  ;;  %v5005_v34 = vld [vmem:[#allocation6_spill] sm:$0xff] }
  0x64   :  { %3445 = vmatpush3.bf16.msra.mxu1 %v3843_v23  ;;  %924 = vmatprep.mubr.f32.mxu1 %v4994_v14  ;;  %v5002_v14 = vand.u32 4294901760, %v4370_v54  ;;  %v5004_v54 = vld [vmem:[#allocation5_spill] sm:$0xff] }
  0x65   :  { %3447 = vmatprep.subr.bf16.mxu1 %v3845_v24  ;;  %3423 = vmatprep.subr.bf16.mxu0 %v4469_v20 }
  0x66   :  { %v4633_v30 = vpack.c.bf16 %v5003_v1, %v5002_v14  ;;  %v5008_v14 = vld [vmem:[#allocation8_spill] sm:$0xff]  ;;  %v4661_v1 = vand.u32 4294901760, %v936_v17 }
  0x67   :  { %3425 = vmatpush3.bf16.msra.mxu0 %v4475_v53 }
  0x68   :  { %3449 = vmatpush3.bf16.msra.mxu1 %v3861_v29  ;;  %3427 = vmatprep.subr.bf16.mxu0 %v4481_v32  ;;  %v4668_v25 = vsub.f32 %v936_v17, %v4661_v1 }
  0x69   :  { %3451 = vmatprep.subr.bf16.mxu1 %v3872_v33 }
  0x6b   :  { %3429 = vmatpush3.bf16.msra.mxu0 %v4489_v2 }
  0x6c   :  { %3453 = vmatpush3.bf16.msra.mxu1 %v3890_v39  ;;  %3431 = vmatprep.subr.bf16.mxu0 %v4495_v35 }
  0x6d   :  { %3455 = vmatprep.subr.bf16.mxu1 %v3913_v48 }
  0x6f   :  { %3433 = vmatpush3.bf16.msra.mxu0 %v4501_v58 }
  0x70   :  { %3457 = vmatpush3.bf16.msra.mxu1 %v3955_v3  ;;  %3435 = vmatprep.subr.bf16.mxu0 %v4512_v57 }
  0x71   :  { %3459 = vmatprep.subr.bf16.mxu1 %v4011_v19 }
  0x73   :  { %3437 = vmatpush3.bf16.msra.mxu0 %v4518_v6 }
  0x74   :  { %3461 = vmatpush3.bf16.msra.mxu1 %v4020_v61  ;;  %3439 = vmatprep.subr.bf16.mxu0 %v4623_v62 }
  0x75   :  { %3463 = vmatprep.subr.bf16.mxu1 %v4065_v55 }
  0x77   :  { %3441 = vmatpush3.bf16.msra.mxu0 %v4633_v30 }
  0x78   :  { %3465 = vmatpush3.bf16.msra.mxu1 %v4117_v9  ;;  %3475 = vmatprep.subr.bf16.mxu0 %v3825_v16 }
  0x79   :  { %3467 = vmatprep.subr.bf16.mxu1 %v4991_v38 }
  0x7a   :  { %822 = vmatmul.mubr.f32.vlgmr.msra.gmra.mrb[4].mxu0 %v4335_v27 }
  0x7b   :  { %3477 = vmatpush3.bf16.msra.mxu0 %v3843_v23  ;;  %1044 = vmatprep.mubr.f32.mxu0 %v1043_v13  ;;  %v5011_v13 = vld [vmem:[#allocation12_spill] sm:$0xff] }
  0x7c   :  { %3469 = vmatpush3.bf16.msra.mxu1 %v4992_v0  ;;  %3479 = vmatprep.subr.bf16.mxu0 %v3845_v24 }
  0x7d   :  { %3471 = vmatprep.subr.bf16.mxu1 %v4993_v15 }
  0x7f   :  { %3481 = vmatpush3.bf16.msra.mxu0 %v3861_v29 }
  0x80   :  { %3473 = vmatpush3.bf16.msra.mxu1 %v4995_v43  ;;  %3483 = vmatprep.subr.bf16.mxu0 %v3872_v33 }
  0x81   :  { %3507 = vmatprep.subr.bf16.mxu1 %v5004_v54  ;;  %v5012_v54 = vld [vmem:[#allocation14_spill] sm:$0xff] }
  0x83   :  { %926 = vmatmul.mubr.f32.vlgmr.msra.gmra.mrb[4].mxu1 %v4335_v27  ;;  %3485 = vmatpush3.bf16.msra.mxu0 %v3890_v39  ;;  %v5009_v27 = vld [vmem:[#allocation9_spill] sm:$0xff] }
  0x84   :  { %3509 = vmatpush3.bf16.msra.mxu1 %v5005_v34  ;;  %1280 = vmatprep.mubr.f32.mxu1 %v4606_v7  ;;  %v1047_v34 = vand.u32 4294901760, %v4668_v25 }
  0x85   :  { %3511 = vmatprep.subr.bf16.mxu1 %v5007_v42  ;;  %3487 = vmatprep.subr.bf16.mxu0 %v3913_v48  ;;  %v5014_v42 = vld [vmem:[#allocation18_spill] sm:$0xff] }
  0x86   :  { %v1048_v17 = vsub.f32 %v4668_v25, %v1047_v34 }
  0x87   :  { %3489 = vmatpush3.bf16.msra.mxu0 %v3955_v3 }
  0x88   :  { %3513 = vmatpush3.bf16.msra.mxu1 %v5008_v14  ;;  %3491 = vmatprep.subr.bf16.mxu0 %v4011_v19  ;;  %v5015_v14 = vld [vmem:[#allocation22_spill] sm:$0xff] }
  0x89   :  { %3515 = vmatprep.subr.bf16.mxu1 %v5009_v27  ;;  %v5016_v27 = vld [vmem:[#allocation23_spill] sm:$0xff] }
  0x8b   :  { %3493 = vmatpush3.bf16.msra.mxu0 %v4020_v61 }
  0x8c   :  { %3517 = vmatpush3.bf16.msra.mxu1 %v5010_v51  ;;  %3495 = vmatprep.subr.bf16.mxu0 %v4065_v55  ;;  %v1049_v51 = vand.u32 4294901760, %v1048_v17 }
  0x8d   :  { %3519 = vmatprep.subr.bf16.mxu1 %v5011_v13  ;;  %v5017_v13 = vld [vmem:[#allocation25_spill] sm:$0xff] }
  0x8f   :  { %3497 = vmatpush3.bf16.msra.mxu0 %v4117_v9 }
  0x90   :  { %3521 = vmatpush3.bf16.msra.mxu1 %v5012_v54  ;;  %3499 = vmatprep.subr.bf16.mxu0 %v4991_v38  ;;  %v5018_v54 = vld [vmem:[#allocation21_spill] sm:$0xff] }
  0x91   :  { %3523 = vmatprep.subr.bf16.mxu1 %v5013_v36  ;;  %v5019_v36 = vld [vmem:[#allocation27_spill] sm:$0xff] }
  0x93   :  { %3501 = vmatpush3.bf16.msra.mxu0 %v4992_v0 }
  0x94   :  { %3525 = vmatpush3.bf16.msra.mxu1 %v5014_v42  ;;  %3503 = vmatprep.subr.bf16.mxu0 %v4993_v15  ;;  %v5020_v42 = vld [vmem:[#allocation26_spill] sm:$0xff] }
  0x95   :  { %3527 = vmatprep.subr.bf16.mxu1 %v5015_v14 }
  0x97   :  { %3505 = vmatpush3.bf16.msra.mxu0 %v4995_v43 }
  0x98   :  { %3529 = vmatpush3.bf16.msra.mxu1 %v5016_v27  ;;  %3539 = vmatprep.subr.bf16.mxu0 %v5018_v54 }
  0x99   :  { %3531 = vmatprep.subr.bf16.mxu1 %v5017_v13 }
  0x9a   :  { %1050 = vmatmul.mubr.f32.vlgmr.msra.gmra.mrb[6].mxu0 %v1049_v51 }
  0x9b   :  { %3541 = vmatpush3.bf16.msra.mxu0 %v4395_v50  ;;  %1417 = vmatprep.mubr.f32.mxu0 %v4613_v45 }
  0x9c   :  { %3533 = vmatpush3.bf16.msra.mxu1 %v4390_v12  ;;  %3543 = vmatprep.subr.bf16.mxu0 %v5020_v42 }
  0x9d   :  { %3535 = vmatprep.subr.bf16.mxu1 %v5019_v36 }
  0x9f   :  { %3545 = vmatpush3.bf16.msra.mxu0 %v4414_v59 }
  0xa0   :  { %3537 = vmatpush3.bf16.msra.mxu1 %v4421_v46  ;;  %3547 = vmatprep.subr.bf16.mxu0 %v4418_v10 }
  0xa1   :  { %3571 = vmatprep.subr.bf16.mxu1 %v3825_v16 }
  0xa3   :  { %1282 = vmatmul.mubr.f32.vlgmr.msra.gmra.mrb[6].mxu1 %v4661_v1  ;;  %3549 = vmatpush3.bf16.msra.mxu0 %v4425_v44 }
  0xa4   :  { %3573 = vmatpush3.bf16.msra.mxu1 %v3843_v23  ;;  %1524 = vmatprep.mubr.f32.mxu1 %v1041_v8 }
  0xa5   :  { %3575 = vmatprep.subr.bf16.mxu1 %v3845_v24  ;;  %3551 = vmatprep.subr.bf16.mxu0 %v4506_v63 }
  0xa7   :  { %3553 = vmatpush3.bf16.msra.mxu0 %v4526_v60 }
  0xa8   :  { %3577 = vmatpush3.bf16.msra.mxu1 %v3861_v29  ;;  %3555 = vmatprep.subr.bf16.mxu0 %v4531_v22 }
  0xa9   :  { %3579 = vmatprep.subr.bf16.mxu1 %v3872_v33 }
  0xab   :  { %3557 = vmatpush3.bf16.msra.mxu0 %v4538_v28 }
  0xac   :  { %3581 = vmatpush3.bf16.msra.mxu1 %v3890_v39  ;;  %3559 = vmatprep.subr.bf16.mxu0 %v4543_v18 }
  0xad   :  { %3583 = vmatprep.subr.bf16.mxu1 %v3913_v48 }
  0xaf   :  { %3561 = vmatpush3.bf16.msra.mxu0 %v4550_v41 }
  0xb0   :  { %3585 = vmatpush3.bf16.msra.mxu1 %v3955_v3  ;;  %3563 = vmatprep.subr.bf16.mxu0 %v4555_v11 }
  0xb1   :  { %3587 = vmatprep.subr.bf16.mxu1 %v4011_v19 }
  0xb3   :  { %3565 = vmatpush3.bf16.msra.mxu0 %v4562_v37 }
  0xb4   :  { %3589 = vmatpush3.bf16.msra.mxu1 %v4020_v61  ;;  %3567 = vmatprep.subr.bf16.mxu0 %v4567_v31 }
  0xb5   :  { %3591 = vmatprep.subr.bf16.mxu1 %v4065_v55 }
  0xb7   :  { %3569 = vmatpush3.bf16.msra.mxu0 %v4574_v56 }
  0xb8   :  { %3593 = vmatpush3.bf16.msra.mxu1 %v4117_v9  ;;  %3603 = vmatprep.subr.bf16.mxu0 %v4432_v52 }
  0xb9   :  { %3595 = vmatprep.subr.bf16.mxu1 %v4991_v38 }
  0xba   :  { %1420 = vmatmul.mubr.f32.vlgmr.msra.gmra.mrb[8].mxu0 %v4668_v25 }
  0xbb   :  { %3605 = vmatpush3.bf16.msra.mxu0 %v4438_v21  ;;  %1694 = vmatprep.mubr.f32.mxu0 %v4606_v7 }
  0xbc   :  { %3597 = vmatpush3.bf16.msra.mxu1 %v4992_v0  ;;  %3607 = vmatprep.subr.bf16.mxu0 %v4444_v4 }
  0xbd   :  { %3599 = vmatprep.subr.bf16.mxu1 %v4993_v15 }
  0xbf   :  { %3609 = vmatpush3.bf16.msra.mxu0 %v4450_v40 }
  0xc0   :  { %3601 = vmatpush3.bf16.msra.mxu1 %v4995_v43  ;;  %3611 = vmatprep.subr.bf16.mxu0 %v4456_v5 }
  0xc1   :  { %3635 = vmatprep.subr.bf16.mxu1 %v3825_v16  ;;  %v55_v16 = vld [vmem:[%s4849_s4 + $0x8] sm:$0xff] }
  0xc3   :  { %1528 = vmatmul.mubr.f32.vlgmr.msra.gmra.mrb[8].mxu1 %v1047_v34  ;;  %3613 = vmatpush3.bf16.msra.mxu0 %v4463_v49 }
  0xc4   :  { %3637 = vmatpush3.bf16.msra.mxu1 %v3843_v23  ;;  %1798 = vmatprep.mubr.f32.mxu1 %v4606_v7  ;;  %v57_v23 = vld [vmem:[%s4849_s4 + $0x18] sm:$0xff] }
  0xc5   :  { %3639 = vmatprep.subr.bf16.mxu1 %v3845_v24  ;;  %3615 = vmatprep.subr.bf16.mxu0 %v4469_v20  ;;  %v54_v24 = vld [vmem:[%s4849_s4] sm:$0xff] }
  0xc7   :  { %3617 = vmatpush3.bf16.msra.mxu0 %v4475_v53 }
  0xc8   :  { %3641 = vmatpush3.bf16.msra.mxu1 %v3861_v29  ;;  %3619 = vmatprep.subr.bf16.mxu0 %v4481_v32  ;;  %v1816_v29 = vand.u32 4294901760, %v55_v16 }
  0xc9   :  { %3643 = vmatprep.subr.bf16.mxu1 %v3872_v33  ;;  %v1820_v33 = vand.u32 4294901760, %v57_v23 }
  0xcb   :  { %3621 = vmatpush3.bf16.msra.mxu0 %v4489_v2 }
  0xcc   :  { %3645 = vmatpush3.bf16.msra.mxu1 %v3890_v39  ;;  %3623 = vmatprep.subr.bf16.mxu0 %v4495_v35  ;;  %v56_v39 = vld [vmem:[%s4849_s4 + $0x10] sm:$0xff] }
  0xcd   :  { %3647 = vmatprep.subr.bf16.mxu1 %v3913_v48  ;;  %v1818_v48 = vand.u32 4294901760, %v54_v24 }
  0xcf   :  { %3625 = vmatpush3.bf16.msra.mxu0 %v4501_v58  ;;  %v1903_v21 = vsub.f32 %v54_v24, %v1818_v48 }
  0xd0   :  { %3649 = vmatpush3.bf16.msra.mxu1 %v3955_v3  ;;  %3627 = vmatprep.subr.bf16.mxu0 %v4512_v57  ;;  %v3763_v3 = vmov 0.0  }
  0xd1   :  { %3651 = vmatprep.subr.bf16.mxu1 %v4011_v19  ;;  %v1822_v19 = vand.u32 4294901760, %v56_v39  ;;  %v1904_v40 = vand.u32 4294901760, %v1903_v21 }
  0xd3   :  { %3629 = vmatpush3.bf16.msra.mxu0 %v4518_v6  ;;  %v4778_v12 = vpack.c.bf16 %v1822_v19, %v1818_v48  ;;  %v1915_v10 = vsub.f32 %v56_v39, %v1822_v19  ;;  %v1905_v52 = vsub.f32 %v1903_v21, %v1904_v40 }
  0xd4   :  { %3653 = vmatpush3.bf16.msra.mxu1 %v4020_v61  ;;  %3631 = vmatprep.subr.bf16.mxu0 %v4623_v62  ;;  %v4775_v61 = vpack.c.bf16 %v1820_v33, %v1816_v29 }
  0xd5   :  { %3655 = vmatprep.subr.bf16.mxu1 %v4065_v55  ;;  %v1897_v55 = vsub.f32 %v55_v16, %v1816_v29  ;;  %v1916_v59 = vand.u32 4294901760, %v1915_v10  ;;  %v1906_v53 = vand.u32 4294901760, %v1905_v52  ;;  %v4788_v63 = vpack.c.bf16 %v1915_v10, %v1903_v21 }
  0xd7   :  { %3633 = vmatpush3.bf16.msra.mxu0 %v4633_v30  ;;  %v1898_v50 = vand.u32 4294901760, %v1897_v55  ;;  %v1917_v5 = vsub.f32 %v1915_v10, %v1916_v59  ;;  %v4792_v6 = vpack.c.bf16 %v1916_v59, %v1904_v40 }
  0xd8   :  { %3657 = vmatpush3.bf16.msra.mxu1 %v4117_v9  ;;  %v1909_v9 = vsub.f32 %v57_v23, %v1820_v33  ;;  %3667 = vmatprep.subr.bf16.mxu0 %v4775_v61 }
  0xd9   :  { %3659 = vmatprep.subr.bf16.mxu1 %v4991_v38  ;;  %v1899_v46 = vsub.f32 %v1897_v55, %v1898_v50  ;;  %v1918_v32 = vand.u32 4294901760, %v1917_v5 }
  0xda   :  { %1696 = vmatmul.mubr.f32.vlgmr.msra.gmra.mrb[10].mxu0 %v4661_v1  ;;  %v1910_v4 = vand.u32 4294901760, %v1909_v9  ;;  %v4786_v58 = vpack.c.bf16 %v1909_v9, %v1897_v55 }
  0xdb   :  { %1884 = vmatprep.mubr.f32.mxu0 %v3763_v3  ;;  %3669 = vmatpush1.bf16.msra.mxu0 %v4778_v12  ;;  %v1900_v49 = vand.u32 4294901760, %v1899_v46  ;;  %v4784_v35 = vpack.c.bf16 %v1918_v32, %v1906_v53 }
  0xdc   :  { %3661 = vmatpush3.bf16.msra.mxu1 %v4992_v0  ;;  %v1911_v44 = vsub.f32 %v1909_v9, %v1910_v4  ;;  %v4790_v57 = vpack.c.bf16 %v1910_v4, %v1898_v50 }
  0xdd   :  { %3663 = vmatprep.subr.bf16.mxu1 %v4993_v15 }
  0xde   :  { %v1912_v20 = vand.u32 4294901760, %v1911_v44 }
  0xe0   :  { %3665 = vmatpush3.bf16.msra.mxu1 %v4995_v43  ;;  %v3670_v2 = vpack.c.bf16 %v1912_v20, %v1900_v49 }
  0xe1   :  { %3691 = vmatprep.subr.bf16.mxu1 %v4775_v61 }
  0xe2   :  { %3671 = vmatprep.subr.bf16.mxu0 %v3670_v2 }
  0xe3   :  { %1800 = vmatmul.mubr.f32.vlgmr.msra.gmra.mrb[10].mxu1 %v4661_v1 }
  0xe4   :  { %2378 = vmatprep.mubr.f32.mxu1 %v3763_v3  ;;  %3693 = vmatpush1.bf16.msra.mxu1 %v4778_v12 }
  0xe5   :  { %3695 = vmatprep.subr.bf16.mxu1 %v3670_v2 }
 0x10d   :  { %v2894_v60 = vpop.f32.mrb[0].mxu0 }
 0x10e   :  { %v2895_v22 = vpop.f32.mrb[1].mxu0 }
 0x10f   :  { %v2896_v28 = vadd.f32 %v2895_v22, %v2894_v60 }
 0x116   :  { %v2929_v18 = vpop.f32.mrb[0].mxu1 }
 0x117   :  { %v2930_v41 = vpop.f32.mrb[1].mxu1 }
 0x118   :  { %v2931_v11 = vadd.f32 %v2930_v41, %v2929_v18 }
 0x11a   :  { %v410_v37 = vadd.f32 %v2931_v11, %v2896_v28 }
 0x12d   :  { %v2964_v31 = vpop.f32.mrb[2].mxu0 }
 0x12e   :  { %v2965_v56 = vpop.f32.mrb[3].mxu0 }
 0x12f   :  { %v2966_v38 = vadd.f32 %v2965_v56, %v2964_v31 }
 0x131   :  { %v548_v0 = vadd.f32 %v2966_v38, %v410_v37 }
 0x136   :  { %v2999_v15 = vpop.f32.mrb[2].mxu1 }
 0x137   :  { %v3000_v43 = vpop.f32.mrb[3].mxu1 }
 0x138   :  { %v3001_v7 = vadd.f32 %v3000_v43, %v2999_v15  ;;  %v3764_v15 = vmov 1966171168  }
 0x139   :  { %v2807_v43 = vunpack.c.l.s4 %v3764_v15 }
 0x13a   :  { %v656_v45 = vadd.f32 %v3001_v7, %v548_v0 }
 0x13b   :  { %v2808_v7 = vunpack.c.0.s8 %v2807_v43 }
 0x14d   :  { %v3034_v62 = vpop.f32.mrb[4].mxu0 }
 0x14e   :  { %v3035_v8 = vpop.f32.mrb[5].mxu0 }
 0x14f   :  { %v3036_v30 = vadd.f32 %v3035_v8, %v3034_v62 }
 0x151   :  { %v824_v1 = vadd.f32 %v3036_v30, %v656_v45 }
 0x156   :  { %v3069_v25 = vpop.f32.mrb[4].mxu1 }
 0x157   :  { %v3070_v34 = vpop.f32.mrb[5].mxu1 }
 0x158   :  { %v3071_v17 = vadd.f32 %v3070_v34, %v3069_v25  ;;  %v2802_v34 = vld [vmem:[%s4847_s2] sm:$0x3] }
 0x15a   :  { %v928_v14 = vadd.f32 %v3071_v17, %v824_v1  ;;  %v5021_v17 = vlaneseq }
 0x15c   :  { %v1805_v27 = vmul.f32 0.0625, %v928_v14  ;;  %vm2845_vm1 = vcmp.lt.s32.totalorder %v5021_v17, 256 }
 0x15e   :  { %v1814_v51 = vsel %vm1812_vm0, %v1805_v27, 0  ;;  %v1807_v2 = vmul.f32 %v1805_v27, %v1805_v27 }
 0x15f   :  { %v1885_v13 = vand.u32 4294901760, %v1814_v51 }
 0x161   :  { %v1886_v54 = vsub.f32 %v1814_v51, %v1885_v13 }
 0x163   :  { %v1887_v36 = vand.u32 4294901760, %v1886_v54 }
 0x165   :  { %v1888_v42 = vsub.f32 %v1886_v54, %v1887_v36 }
 0x167   :  { %v1889_v16 = vand.u32 4294901760, %v1888_v42 }
 0x169   :  { %1890 = vmatmul.mubr.f32.vlgmr.msra.gmra.mrb[12].mxu0 %v1889_v16 }
 0x16a   :  { %3673 = vmatpush1.bf16.msra.mxu0 %v4784_v35  ;;  %1980 = vmatprep.mubr.f32.mxu0 %v3763_v3 }
 0x16b   :  { %3675 = vmatprep.subr.bf16.mxu0 %v4786_v58 }
 0x16d   :  { %v3104_v23 = vpop.f32.mrb[6].mxu0 }
 0x16e   :  { %v3105_v24 = vpop.f32.mrb[7].mxu0 }
 0x16f   :  { %v3106_v29 = vadd.f32 %v3105_v24, %v3104_v23 }
 0x171   :  { %1982 = vmatmul.mubr.f32.vlgmr.msra.gmra.mrb[12].mxu0 %v1885_v13 }
 0x172   :  { %3677 = vmatpush1.bf16.msra.mxu0 %v4788_v63  ;;  %2060 = vmatprep.mubr.f32.mxu0 %v3763_v3 }
 0x173   :  { %3679 = vmatprep.subr.bf16.mxu0 %v4775_v61 }
 0x176   :  { %v3139_v33 = vpop.f32.mrb[6].mxu1 }
 0x177   :  { %v3140_v39 = vpop.f32.mrb[7].mxu1 }
 0x178   :  { %v3141_v48 = vadd.f32 %v3140_v39, %v3139_v33 }
 0x179   :  { %2063 = vmatmul.mubr.f32.vlgmr.msra.gmra.mrb[12].mxu0 %v1886_v54 }
 0x17a   :  { %v1284_v19 = vadd.f32 %v3141_v48, %v3106_v29  ;;  %3681 = vmatpush1.bf16.msra.mxu0 %v4778_v12  ;;  %2137 = vmatprep.mubr.f32.mxu0 %v3763_v3 }
 0x17b   :  { %3683 = vmatprep.subr.bf16.mxu0 %v4790_v57 }
 0x181   :  { %2141 = vmatmul.mubr.f32.vlgmr.msra.gmra.mrb[12].mxu0 %v1887_v36 }
 0x182   :  { %3685 = vmatpush1.bf16.msra.mxu0 %v4792_v6  ;;  %2223 = vmatprep.mubr.f32.mxu0 %v3763_v3 }
 0x183   :  { %3687 = vmatprep.subr.bf16.mxu0 %v4775_v61 }
 0x189   :  { %2225 = vmatmul.mubr.f32.vlgmr.msra.gmra.mrb[12].mxu0 %v1885_v13 }
 0x18a   :  { %3689 = vmatpush1.bf16.msra.mxu0 %v4778_v12  ;;  %2299 = vmatprep.mubr.f32.mxu0 %v3763_v3 }
 0x18d   :  { %v3174_v55 = vpop.f32.mrb[8].mxu0 }
 0x18e   :  { %v3175_v9 = vpop.f32.mrb[9].mxu0 }
 0x18f   :  { %v3176_v21 = vadd.f32 %v3175_v9, %v3174_v55 }
 0x191   :  { %2301 = vmatmul.mubr.f32.vlgmr.msra.gmra.mrb[12].mxu0 %v1885_v13  ;;  %v1422_v10 = vadd.f32 %v3176_v21, %v1284_v19 }
 0x196   :  { %v3209_v50 = vpop.f32.mrb[8].mxu1 }
 0x197   :  { %v3210_v4 = vpop.f32.mrb[9].mxu1 }
 0x198   :  { %v3211_v40 = vadd.f32 %v3210_v4, %v3209_v50 }
 0x19a   :  { %v1530_v59 = vadd.f32 %v3211_v40, %v1422_v10 }
 0x1ad   :  { %v3244_v46 = vpop.f32.mrb[10].mxu0 }
 0x1ae   :  { %v3245_v44 = vpop.f32.mrb[11].mxu0 }
 0x1af   :  { %v3246_v52 = vadd.f32 %v3245_v44, %v3244_v46 }
 0x1b1   :  { %v1698_v5 = vadd.f32 %v3246_v52, %v1530_v59 }
 0x1b6   :  { %v3279_v49 = vpop.f32.mrb[10].mxu1 }
 0x1b7   :  { %v3280_v20 = vpop.f32.mrb[11].mxu1 }
 0x1b8   :  { %v3281_v53 = vadd.f32 %v3280_v20, %v3279_v49 }
 0x1ba   :  { %v1802_v32 = vadd.f32 %v3281_v53, %v1698_v5 }
 0x1bc   :  { %v1806_v60 = vmul.f32 0.0625, %v1802_v32 }
 0x1be   :  { %v1808_v22 = vsub.f32 %v1806_v60, %v1807_v2 }
 0x1c0   :  { %v1809_v28 = vmax.f32 %v1808_v22, 0.0 }
 0x1c2   :  { %v1810_v18 = vadd.f32 1e-05, %v1809_v28 }
 0x1c4   :  { %3737 = vrsqrt.f32 %v1810_v18 }
 0x1ce   :  { %v3738_v41 = vpop.eup %3737 }
 0x1cf   :  { %v2308_v11 = vsel %vm1812_vm0, %v3738_v41, 0 }
 0x1d0   :  { %v2379_v37 = vand.u32 4294901760, %v2308_v11 }
 0x1d2   :  { %v2380_v31 = vsub.f32 %v2308_v11, %v2379_v37 }
 0x1d4   :  { %v2381_v56 = vand.u32 4294901760, %v2380_v31 }
 0x1d6   :  { %v2382_v38 = vsub.f32 %v2380_v31, %v2381_v56 }
 0x1d8   :  { %v2383_v0 = vand.u32 4294901760, %v2382_v38 }
 0x1da   :  { %2384 = vmatmul.mubr.f32.vlgmr.msra.gmra.mrb[12].mxu1 %v2383_v0 }
 0x1db   :  { %3697 = vmatpush1.bf16.msra.mxu1 %v4784_v35  ;;  %2474 = vmatprep.mubr.f32.mxu1 %v3763_v3 }
 0x1dc   :  { %3699 = vmatprep.subr.bf16.mxu1 %v4786_v58 }
 0x1e2   :  { %2476 = vmatmul.mubr.f32.vlgmr.msra.gmra.mrb[12].mxu1 %v2379_v37 }
 0x1e3   :  { %3701 = vmatpush1.bf16.msra.mxu1 %v4788_v63  ;;  %2554 = vmatprep.mubr.f32.mxu1 %v3763_v3 }
 0x1e4   :  { %3703 = vmatprep.subr.bf16.mxu1 %v4775_v61 }
 0x1ea   :  { %2557 = vmatmul.mubr.f32.vlgmr.msra.gmra.mrb[12].mxu1 %v2380_v31 }
 0x1eb   :  { %3705 = vmatpush1.bf16.msra.mxu1 %v4778_v12  ;;  %2631 = vmatprep.mubr.f32.mxu1 %v3763_v3 }
 0x1ec   :  { %3707 = vmatprep.subr.bf16.mxu1 %v4790_v57  ;;  %v2811_v57 = vsub.s32 %v2808_v7, %v4998_v26 }
 0x1f2   :  { %2635 = vmatmul.mubr.f32.vlgmr.msra.gmra.mrb[12].mxu1 %v2381_v56 }
 0x1f3   :  { %3709 = vmatpush1.bf16.msra.mxu1 %v4792_v6  ;;  %2717 = vmatprep.mubr.f32.mxu1 %v3763_v3 }
 0x1f4   :  { %3711 = vmatprep.subr.bf16.mxu1 %v4775_v61 }
 0x1fa   :  { %2719 = vmatmul.mubr.f32.vlgmr.msra.gmra.mrb[12].mxu1 %v2379_v37 }
 0x1fb   :  { %3713 = vmatpush1.bf16.msra.mxu1 %v4778_v12  ;;  %2793 = vmatprep.mubr.f32.mxu1 %v3763_v3  ;;  %v2801_v3 = vld [vmem:[%s4846_s1] sm:$0x3] }
 0x202   :  { %2795 = vmatmul.mubr.f32.vlgmr.msra.gmra.mrb[12].mxu1 %v2379_v37 }
 0x264   :  { %v2302_v35 = vpop.f32.mrb[12].mxu0 }
 0x265   :  { %v2304_v58 = vpop.f32.mrb[13].mxu0 }
 0x266   :  { %v2805_v63 = vcombine.low %v2302_v35, %v2304_v58 }
 0x268   :  { %v2812_v45 = vrot.slane %v2805_v63, %v2811_v57 }
 0x26a   :  { %v2819_v8 = vrot.slane %v2812_v45, %v2811_v57 }
 0x26c   :  { %v2821_v1 = vsub.f32 %v4996_v47, %v2819_v8 }
 0x2d5   :  { %v2796_v6 = vpop.f32.mrb[12].mxu1 }
 0x2d6   :  { %v2798_v62 = vpop.f32.mrb[13].mxu1 }
 0x2d7   :  { %v2824_v30 = vcombine.low %v2796_v6, %v2798_v62 }
 0x2d9   :  { %v2831_v61 = vrot.slane %v2824_v30, %v2811_v57 }
 0x2db   :  { %v2838_v12 = vrot.slane %v2831_v61, %v2811_v57 }
 0x2dd   :  { %v2840_v25 = vmul.f32 %v2838_v12, %v2821_v1 }
 0x2df   :  { %v2841_v26 = vmul.f32 %v2840_v25, %v2801_v3 }
 0x2e1   :  { %v2842_v14 = vadd.f32 %v2841_v26, %v2802_v34 }
 0x2e3   :  { %2847 = vst.msk [vmem:[#allocation2] sm:$0x3] %vm2845_vm1, %v2842_v14 }
 0x2e4   :  { %3750 = shalt.err (!%p3747_p4)
}
 0x2e5   :  { %s3751_s22 = scalar_lea.hbm %s4850_s5, 32 }
 0x2e6   :  { %p3752_p5 = scmp.ne.s32.totalorder %s4850_s5, %s3751_s22  ;;  %p3755_p6 = scmp.lt.u32.totalorder %s3751_s22, %s4850_s5 }
 0x2e8   :  { %p3757_p7 = pnand %p3755_p6, %p3752_p5 }
 0x2ea   :  { %3760 = shalt.err (!%p3757_p7)
}
 0x2eb   :  { %2857 = dma.vmem_to_hbm [thread:$0]  %s2855_s19, 32, %s4850_s5, [#allocation3]  }
 0x2ec   :  { %3761 = dma.done.wait [#allocation3], 32  }
 0x2ed   :  { %3762 = vsyncadd [#allocation3], 4294967264 }
 0x2ee   :  { %2861 = vsyncpa [#allocation3], 1 }

</bundles_post_ra>
